<compile_context>
chip_gen: v7x
topology: tpu7x:2x2x1
jax: 0.10.0
libtpu: 0.0.40
codegen_flags: <defaults>
</compile_context>

<pallas_src>
import functools

import jax
import jax.numpy as jnp
from jax.experimental import pallas as pl
from jax.experimental.pallas import tpu as pltpu


def _round_up(n, m):
    return -(-n // m) * m


def _fused_mlp_kernel(*refs, num_hidden: int, eps: float):
    """refs = (x, w_0..w_{H-1}, [gamma/beta stack if H>0], w_last, b_last, out)."""
    x_ref = refs[0]
    o_ref = refs[-1]
    w_last_ref, b_last_ref = refs[-3], refs[-2]

    h = x_ref[...].astype(jnp.float32)

    if num_hidden > 0:
        bn_ref = refs[1 + num_hidden]          # (2*H, hidden_dim) f32: rows = g0,b0,g1,b1,...
        inv_m = 1.0 / x_ref.shape[0]           # static batch size
        for i in range(num_hidden):
            w_ref = refs[1 + i]
            # MXU: bf16 x bf16 -> f32 accumulation.  Hidden Linear bias omitted:
            # it is exactly cancelled by the batch-mean subtraction below.
            z = jnp.dot(h.astype(jnp.bfloat16), w_ref[...],
                        preferred_element_type=jnp.float32)
            # One-pass batch stats: two independent reductions (not serialized).
            s1 = jnp.sum(z, axis=0, keepdims=True)
            s2 = jnp.sum(z * z, axis=0, keepdims=True)
            mean = s1 * inv_m
            var = jnp.maximum(s2 * inv_m - mean * mean, 0.0)   # clamp before rsqrt
            gamma = bn_ref[2 * i:2 * i + 1, :]
            beta = bn_ref[2 * i + 1:2 * i + 2, :]
            scale = gamma * jax.lax.rsqrt(var + eps)           # rsqrt -> EUP slot
            shift = beta - mean * scale
            h = jnp.maximum(z * scale + shift, 0.0)            # folded BN + ReLU

    out = jnp.dot(h.astype(jnp.bfloat16), w_last_ref[...],
                  preferred_element_type=jnp.float32) + b_last_ref[...]
    o_ref[...] = out.astype(o_ref.dtype)                        # lane-dense store


def fused_mlp_forward(x, hidden_ws, bn_stack, last_w, last_b, *, out_dim, eps):
    """One grid-less pallas_call for the whole MLP; returns (batch, out_dim) f32."""
    M = x.shape[0]
    n_pad = last_w.shape[1]
    num_hidden = len(hidden_ws)

    inputs = [x, *hidden_ws]
    if num_hidden > 0:
        inputs.append(bn_stack)
    inputs += [last_w, last_b]

    kernel = functools.partial(_fused_mlp_kernel, num_hidden=num_hidden, eps=eps)
    vmem = functools.partial(pl.BlockSpec, memory_space=pltpu.MemorySpace.VMEM)
    out = pl.pallas_call(
        kernel,
        out_shape=jax.ShapeDtypeStruct((M, n_pad), jnp.float32),
        in_specs=[vmem() for _ in inputs],
        out_specs=vmem(),
    )(*inputs)
    # Padded lanes are exact zeros (zero weight columns + zero bias).
    # TODO(synk): for large M let the consumer take the padded (M, n_pad) slab
    # instead of paying an extra HBM pass for this slice.
    return out[:, :out_dim]


class MLP:
    """JAX/Pallas port of solution_methods/L2D/network/mlp.py::MLP (forward only)."""

    def __init__(self, num_layers, input_dim, hidden_dim, output_dim, key, eps=1e-5):
        if num_layers < 1:
            raise ValueError("The number of layers should be at least 1.")
        self.num_layers = num_layers
        self.num_hidden = num_layers - 1
        self.linear_or_not = (num_layers == 1)
        self.output_dim = output_dim
        self.hidden_dim = hidden_dim
        self.eps = eps

        if num_layers == 1:
            dims = [(input_dim, output_dim)]
        else:
            dims = [(input_dim, hidden_dim)]
            dims += [(hidden_dim, hidden_dim)] * (num_layers - 2)
            dims += [(hidden_dim, output_dim)]

        def init_linear(k, fan_in, fan_out):
            kw, kb = jax.random.split(k)
            bound = 1.0 / float(fan_in) ** 0.5
            w = jax.random.uniform(kw, (fan_in, fan_out), jnp.float32, -bound, bound)
            b = jax.random.uniform(kb, (1, fan_out), jnp.float32, -bound, bound)
            return w, b

        # Hidden Linear layers (bf16 weights for the MXU).  The bias is kept only
        # for the PyTorch-math reference: training-mode BN cancels it exactly, so
        # the fused kernel never loads it.
        self.hidden_ws, self.hidden_bs = [], []
        for (fan_in, fan_out) in dims[:-1]:
            key, sub = jax.random.split(key)
            w, b = init_linear(sub, fan_in, fan_out)
            self.hidden_ws.append(w.astype(jnp.bfloat16))
            self.hidden_bs.append(b)

        # BN affine params (PyTorch init: gamma=1, beta=0), packed for the kernel.
        self.set_bn_affine(
            [jnp.ones((1, hidden_dim), jnp.float32)] * self.num_hidden,
            [jnp.zeros((1, hidden_dim), jnp.float32)] * self.num_hidden)

        # Final layer: zero-pad output lanes to a multiple of 128 so the kernel's
        # single HBM store is lane-dense (unmasked vst).
        fan_in, fan_out = dims[-1]
        key, sub = jax.random.split(key)
        w, b = init_linear(sub, fan_in, fan_out)
        n_pad = _round_up(fan_out, 128)
        w_pad = jnp.zeros((fan_in, n_pad), jnp.float32).at[:, :fan_out].set(w)
        b_pad = jnp.zeros((1, n_pad), jnp.float32).at[:, :fan_out].set(b)
        self.last_w = w_pad.astype(jnp.bfloat16)
        self.last_b = b_pad

    def set_bn_affine(self, gammas, betas):
        """Set BN gamma/beta (lists of (1, hidden_dim)) and rebuild the packed stack."""
        self.gammas = [g.reshape(1, -1) for g in gammas]
        self.betas = [b.reshape(1, -1) for b in betas]
        if self.num_hidden > 0:
            rows = []
            for g, b in zip(self.gammas, self.betas):
                rows += [g, b]
            self.bn_stack = jnp.concatenate(rows, axis=0)   # (2*H, hidden_dim) f32
        else:
            self.bn_stack = None

    def __call__(self, x):
        return fused_mlp_forward(x, self.hidden_ws, self.bn_stack, self.last_w,
                                 self.last_b, out_dim=self.output_dim, eps=self.eps)


def _reference(model, x):
    """Pure-JAX PyTorch-math reference: Linear bias included, two-pass BN stats,
    unfolded affine.  Shares only the bf16 MXU-operand deviation with the kernel."""
    h = x.astype(jnp.float32)
    for w, b, g, be in zip(model.hidden_ws, model.hidden_bs, model.gammas, model.betas):
        z = jnp.dot(h.astype(jnp.bfloat16), w, preferred_element_type=jnp.float32) + b
        mean = jnp.mean(z, axis=0, keepdims=True)
        var = jnp.mean(jnp.square(z - mean), axis=0, keepdims=True)
        z = (z - mean) * jax.lax.rsqrt(var + model.eps) * g + be
        h = jnp.maximum(z, 0.0)
    out = jnp.dot(h.astype(jnp.bfloat16), model.last_w,
                  preferred_element_type=jnp.float32) + model.last_b
    return out[:, :model.output_dim]


if __name__ == "__main__":
    key = jax.random.PRNGKey(0)
    key, k_in, k_m1, k_m2, k_g, k_b = jax.random.split(key, 6)

    batch, num_layers, input_dim, hidden_dim, output_dim = 8, 3, 16, 32, 4
    x = jax.random.normal(k_in, (batch, input_dim), jnp.float32)

    # Deep path: (linear -> BatchNorm(batch stats) -> ReLU) x2 -> linear.
    model = MLP(num_layers, input_dim, hidden_dim, output_dim, k_m1)
    # Use non-trivial BN affine so the folded scale/shift path is actually verified
    # (PyTorch's init is gamma=1, beta=0, which would make the affine a no-op).
    gammas = [jax.random.uniform(jax.random.fold_in(k_g, i), (1, hidden_dim),
                                 jnp.float32, 0.5, 1.5) for i in range(model.num_hidden)]
    betas = [jax.random.uniform(jax.random.fold_in(k_b, i), (1, hidden_dim),
                                jnp.float32, -0.5, 0.5) for i in range(model.num_hidden)]
    model.set_bn_affine(gammas, betas)

    out = jax.block_until_ready(model(x))
    ref = _reference(model, x)
    assert out.shape == (batch, output_dim), out.shape
    assert jnp.allclose(out, ref, atol=1e-2, rtol=1e-2), (
        float(jnp.max(jnp.abs(out - ref))))

    # Single-layer path: plain linear (linear_or_not == True).
    model1 = MLP(1, input_dim, hidden_dim, output_dim, k_m2)
    out1 = jax.block_until_ready(model1(x))
    ref1 = _reference(model1, x)
    assert out1.shape == (batch, output_dim), out1.shape
    assert jnp.allclose(out1, ref1, atol=1e-2, rtol=1e-2), (
        float(jnp.max(jnp.abs(out1 - ref1))))

    print("KERNEL_OK")
</pallas_src>

<mosaic_0001>
module attributes {stable_mosaic.version = 11 : i64} {
  func.func @_fused_mlp_kernel(%arg0: memref<8x16xf32, #tpu.memory_space<vmem>>, %arg1: memref<16x32xbf16, #tpu.memory_space<vmem>>, %arg2: memref<32x32xbf16, #tpu.memory_space<vmem>>, %arg3: memref<4x32xf32, #tpu.memory_space<vmem>>, %arg4: memref<32x128xbf16, #tpu.memory_space<vmem>>, %arg5: memref<1x128xf32, #tpu.memory_space<vmem>>, %arg6: memref<8x128xf32, #tpu.memory_space<vmem>>) attributes {dimension_semantics = [], scalar_prefetch = 0 : i64, scratch_operands = 0 : i64, tpu.core_type = #tpu.core_type<tc>} {
    %c0 = arith.constant 0 : index
    %c0_0 = arith.constant 0 : index
    %0 = vector.load %arg0[%c0, %c0_0] : memref<8x16xf32, #tpu.memory_space<vmem>>, vector<8x16xf32>
    %1 = arith.truncf %0 : vector<8x16xf32> to vector<8x16xbf16>
    %c0_1 = arith.constant 0 : index
    %c0_2 = arith.constant 0 : index
    %2 = vector.load %arg1[%c0_1, %c0_2] : memref<16x32xbf16, #tpu.memory_space<vmem>>, vector<16x32xbf16>
    %cst = arith.constant dense<0.000000e+00> : vector<8x32xf32>
    %3 = tpu.matmul %1, %2, %cst {dimension_numbers = #tpu.dot_dimension_numbers<[1], [0], [0], [1], [0, 0, 1, 1], [], []>} : vector<8x16xbf16>, vector<16x32xbf16>, vector<8x32xf32> -> vector<8x32xf32>
    %cst_3 = arith.constant dense<0.000000e+00> : vector<32xf32>
    %4 = vector.multi_reduction <add>, %3, %cst_3 [0] : vector<8x32xf32> to vector<32xf32>
    %5 = vector.shape_cast %4 : vector<32xf32> to vector<1x32xf32>
    %6 = arith.mulf %3, %3 : vector<8x32xf32>
    %cst_4 = arith.constant dense<0.000000e+00> : vector<32xf32>
    %7 = vector.multi_reduction <add>, %6, %cst_4 [0] : vector<8x32xf32> to vector<32xf32>
    %8 = vector.shape_cast %7 : vector<32xf32> to vector<1x32xf32>
    %cst_5 = arith.constant 1.250000e-01 : f32
    %9 = vector.broadcast %cst_5 : f32 to vector<1x32xf32>
    %10 = arith.mulf %5, %9 : vector<1x32xf32>
    %cst_6 = arith.constant 1.250000e-01 : f32
    %11 = vector.broadcast %cst_6 : f32 to vector<1x32xf32>
    %12 = arith.mulf %8, %11 : vector<1x32xf32>
    %13 = arith.mulf %10, %10 : vector<1x32xf32>
    %14 = arith.subf %12, %13 : vector<1x32xf32>
    %cst_7 = arith.constant 0.000000e+00 : f32
    %15 = vector.broadcast %cst_7 : f32 to vector<1x32xf32>
    %16 = arith.maximumf %14, %15 : vector<1x32xf32>
    %c0_8 = arith.constant 0 : index
    %c0_9 = arith.constant 0 : index
    %17 = vector.load %arg3[%c0_8, %c0_9] : memref<4x32xf32, #tpu.memory_space<vmem>>, vector<1x32xf32>
    %c1 = arith.constant 1 : index
    %c0_10 = arith.constant 0 : index
    %18 = vector.load %arg3[%c1, %c0_10] : memref<4x32xf32, #tpu.memory_space<vmem>>, vector<1x32xf32>
    %cst_11 = arith.constant 9.99999974E-6 : f32
    %19 = vector.broadcast %cst_11 : f32 to vector<1x32xf32>
    %20 = arith.addf %16, %19 : vector<1x32xf32>
    %21 = math.rsqrt %20 : vector<1x32xf32>
    %22 = arith.mulf %17, %21 : vector<1x32xf32>
    %23 = arith.mulf %10, %22 : vector<1x32xf32>
    %24 = arith.subf %18, %23 : vector<1x32xf32>
    %25 = vector.broadcast %22 : vector<1x32xf32> to vector<8x32xf32>
    %26 = arith.mulf %3, %25 : vector<8x32xf32>
    %27 = vector.broadcast %24 : vector<1x32xf32> to vector<8x32xf32>
    %28 = arith.addf %26, %27 : vector<8x32xf32>
    %cst_12 = arith.constant 0.000000e+00 : f32
    %29 = vector.broadcast %cst_12 : f32 to vector<8x32xf32>
    %30 = arith.maximumf %28, %29 : vector<8x32xf32>
    %31 = arith.truncf %30 : vector<8x32xf32> to vector<8x32xbf16>
    %c0_13 = arith.constant 0 : index
    %c0_14 = arith.constant 0 : index
    %32 = vector.load %arg2[%c0_13, %c0_14] : memref<32x32xbf16, #tpu.memory_space<vmem>>, vector<32x32xbf16>
    %cst_15 = arith.constant dense<0.000000e+00> : vector<8x32xf32>
    %33 = tpu.matmul %31, %32, %cst_15 {dimension_numbers = #tpu.dot_dimension_numbers<[1], [0], [0], [1], [0, 0, 1, 1], [], []>} : vector<8x32xbf16>, vector<32x32xbf16>, vector<8x32xf32> -> vector<8x32xf32>
    %cst_16 = arith.constant dense<0.000000e+00> : vector<32xf32>
    %34 = vector.multi_reduction <add>, %33, %cst_16 [0] : vector<8x32xf32> to vector<32xf32>
    %35 = vector.shape_cast %34 : vector<32xf32> to vector<1x32xf32>
    %36 = arith.mulf %33, %33 : vector<8x32xf32>
    %cst_17 = arith.constant dense<0.000000e+00> : vector<32xf32>
    %37 = vector.multi_reduction <add>, %36, %cst_17 [0] : vector<8x32xf32> to vector<32xf32>
    %38 = vector.shape_cast %37 : vector<32xf32> to vector<1x32xf32>
    %cst_18 = arith.constant 1.250000e-01 : f32
    %39 = vector.broadcast %cst_18 : f32 to vector<1x32xf32>
    %40 = arith.mulf %35, %39 : vector<1x32xf32>
    %cst_19 = arith.constant 1.250000e-01 : f32
    %41 = vector.broadcast %cst_19 : f32 to vector<1x32xf32>
    %42 = arith.mulf %38, %41 : vector<1x32xf32>
    %43 = arith.mulf %40, %40 : vector<1x32xf32>
    %44 = arith.subf %42, %43 : vector<1x32xf32>
    %cst_20 = arith.constant 0.000000e+00 : f32
    %45 = vector.broadcast %cst_20 : f32 to vector<1x32xf32>
    %46 = arith.maximumf %44, %45 : vector<1x32xf32>
    %c2 = arith.constant 2 : index
    %c0_21 = arith.constant 0 : index
    %47 = vector.load %arg3[%c2, %c0_21] : memref<4x32xf32, #tpu.memory_space<vmem>>, vector<1x32xf32>
    %c3 = arith.constant 3 : index
    %c0_22 = arith.constant 0 : index
    %48 = vector.load %arg3[%c3, %c0_22] : memref<4x32xf32, #tpu.memory_space<vmem>>, vector<1x32xf32>
    %cst_23 = arith.constant 9.99999974E-6 : f32
    %49 = vector.broadcast %cst_23 : f32 to vector<1x32xf32>
    %50 = arith.addf %46, %49 : vector<1x32xf32>
    %51 = math.rsqrt %50 : vector<1x32xf32>
    %52 = arith.mulf %47, %51 : vector<1x32xf32>
    %53 = arith.mulf %40, %52 : vector<1x32xf32>
    %54 = arith.subf %48, %53 : vector<1x32xf32>
    %55 = vector.broadcast %52 : vector<1x32xf32> to vector<8x32xf32>
    %56 = arith.mulf %33, %55 : vector<8x32xf32>
    %57 = vector.broadcast %54 : vector<1x32xf32> to vector<8x32xf32>
    %58 = arith.addf %56, %57 : vector<8x32xf32>
    %cst_24 = arith.constant 0.000000e+00 : f32
    %59 = vector.broadcast %cst_24 : f32 to vector<8x32xf32>
    %60 = arith.maximumf %58, %59 : vector<8x32xf32>
    %61 = arith.truncf %60 : vector<8x32xf32> to vector<8x32xbf16>
    %c0_25 = arith.constant 0 : index
    %c0_26 = arith.constant 0 : index
    %62 = vector.load %arg4[%c0_25, %c0_26] : memref<32x128xbf16, #tpu.memory_space<vmem>>, vector<32x128xbf16>
    %cst_27 = arith.constant dense<0.000000e+00> : vector<8x128xf32>
    %63 = tpu.matmul %61, %62, %cst_27 {dimension_numbers = #tpu.dot_dimension_numbers<[1], [0], [0], [1], [0, 0, 1, 1], [], []>} : vector<8x32xbf16>, vector<32x128xbf16>, vector<8x128xf32> -> vector<8x128xf32>
    %c0_28 = arith.constant 0 : index
    %c0_29 = arith.constant 0 : index
    %64 = vector.load %arg5[%c0_28, %c0_29] : memref<1x128xf32, #tpu.memory_space<vmem>>, vector<1x128xf32>
    %65 = vector.broadcast %64 : vector<1x128xf32> to vector<8x128xf32>
    %66 = arith.addf %63, %65 : vector<8x128xf32>
    %c0_30 = arith.constant 0 : index
    %c0_31 = arith.constant 0 : index
    %67 = vector.load %arg6[%c0_30, %c0_31] : memref<8x128xf32, #tpu.memory_space<vmem>>, vector<8x128xf32>
    tpu.vector_store %arg6[%c0_30, %c0_31], %66 {strides = array<i32>} : memref<8x128xf32, #tpu.memory_space<vmem>>, vector<8x128xf32>,
    return
  }
}

</mosaic_0001>

<bundles_post_ra>
// kernel: tpu_custom_call.1
= control target key start
LH: loop header
LB: loop body
LE: loop exit
PB: predicated region body
PF: predicated region fallthrough
CT: control target
= control target key end

     0   :  { %11 = vsyncpa [#allocation3], 0  ;;  %s671_s0 = inlined_call_operand.hbm [shape: f32[8,16], index: 0, kind: input, shape index: {}]   ;;  %s672_s1 = inlined_call_operand.hbm [shape: bf16[16,32], index: 1, kind: input, shape index: {}]   ;;  %s673_s2 = inlined_call_operand.hbm [shape: bf16[32,32], index: 2, kind: input, shape index: {}]   ;;  %s674_s3 = inlined_call_operand.vmem [shape: f32[4,32], index: 3, kind: input, shape index: {}]   ;;  %s675_s4 = inlined_call_operand.hbm [shape: bf16[32,128], index: 4, kind: input, shape index: {}]   ;;  %s676_s5 = inlined_call_operand.vmem [shape: f32[1,128], index: 5, kind: input, shape index: {}]   ;;  %s677_s6 = inlined_call_operand.hbm [shape: f32[8,128], index: 6, kind: output, shape index: {}]  }
   0x1   :  { %12 = vsyncpa [#allocation6], 0 }
   0x2   :  { %13 = vsyncpa [#allocation9], 0 }
   0x3   :  { %14 = vsyncpa [#allocation4], 0  ;;  %s529_s21 = smov [#allocation5]   ;;  %s411_s25 = scalar_lea.hbm %s672_s1, 128 }
   0x4   :  { %s30_s22 = sshll.u32 %s529_s21, 4  ;;  %p412_p0 = scmp.ne.s32.totalorder %s672_s1, %s411_s25  ;;  %s31_s22 = int_to_ptr.vmem [resolvable:$true] %s30_s22 }
   0x5   :  { %p415_p1 = scmp.lt.u32.totalorder %s411_s25, %s672_s1 }
   0x7   :  { %p417_p2 = pnand %p415_p1, %p412_p0 }
   0x9   :  { %420 = shalt.err (!%p417_p2)
}
   0xa   :  { %s421_s30 = scalar_lea.vmem %s31_s22, 128  ;;  %p426_p4 = scmp.lt.s32.totalorder %s31_s22, %s31_s22 }
   0xb   :  { %p422_p3 = scmp.ne.s32.totalorder %s31_s22, %s421_s30  ;;  %p427_p5 = scmp.lt.s32.totalorder %s421_s30, %s421_s30 }
   0xd   :  { %p428_p6 = por %p427_p5, %p426_p4 }
   0xf   :  { %p429_p7 = pnand %p428_p6, %p422_p3 }
  0x11   :  { %432 = shalt.err (!%p429_p7)
}
  0x12   :  { %s530_s7 = smov 64   ;;  %s531_s8 = smov 4  }
  0x13   :  { %36 = dma.hbm_to_vmem [thread:$0]  %s672_s1, 128, %s31_s22, [#allocation6], %s530_s7, %s530_s7, %s531_s8  }
  0x14   :  { %s532_s11 = smov [#allocation2]   ;;  %s533_s13 = smov [#allocation7]  }
  0x15   :  { %s21_s12 = sshll.u32 %s532_s11, 4  ;;  %s42_s14 = sshll.u32 %s533_s13, 4  ;;  %s22_s12 = int_to_ptr.vmem [resolvable:$true] %s21_s12  ;;  %s43_s14 = int_to_ptr.vmem [resolvable:$true] %s42_s14 }
  0x16   :  { %s433_s17 = scalar_lea.hbm %s671_s0, 128 }
  0x17   :  { %p434_p8 = scmp.ne.s32.totalorder %s671_s0, %s433_s17  ;;  %p437_p9 = scmp.lt.u32.totalorder %s433_s17, %s671_s0 }
  0x19   :  { %p439_p10 = pnand %p437_p9, %p434_p8 }
  0x1b   :  { %442 = shalt.err (!%p439_p10)
}
  0x1c   :  { %s443_s1 = scalar_lea.vmem %s22_s12, 128  ;;  %p448_p12 = scmp.lt.s32.totalorder %s22_s12, %s22_s12 }
  0x1d   :  { %p444_p11 = scmp.ne.s32.totalorder %s22_s12, %s443_s1  ;;  %p449_p13 = scmp.lt.s32.totalorder %s443_s1, %s443_s1 }
  0x1f   :  { %p450_p0 = por %p449_p13, %p448_p12 }
  0x21   :  { %p451_p1 = pnand %p450_p0, %p444_p11 }
  0x23   :  { %454 = shalt.err (!%p451_p1)
}
  0x24   :  { %24 = dma.hbm_to_vmem [thread:$0]  %s671_s0, 128, %s22_s12, [#allocation3]  }
  0x25   :  { %s455_s26 = scalar_lea.hbm %s673_s2, 256 }
  0x26   :  { %p456_p2 = scmp.ne.s32.totalorder %s673_s2, %s455_s26  ;;  %p459_p3 = scmp.lt.u32.totalorder %s455_s26, %s673_s2 }
  0x28   :  { %p461_p4 = pnand %p459_p3, %p456_p2 }
  0x2a   :  { %464 = shalt.err (!%p461_p4)
}
  0x2b   :  { %s465_s9 = scalar_lea.vmem %s43_s14, 256  ;;  %p470_p6 = scmp.lt.s32.totalorder %s43_s14, %s43_s14 }
  0x2c   :  { %p466_p5 = scmp.ne.s32.totalorder %s43_s14, %s465_s9  ;;  %p471_p7 = scmp.lt.s32.totalorder %s465_s9, %s465_s9 }
  0x2e   :  { %p472_p8 = por %p471_p7, %p470_p6 }
  0x30   :  { %p473_p9 = pnand %p472_p8, %p466_p5 }
  0x32   :  { %476 = shalt.err (!%p473_p9)
}
  0x33   :  { %48 = dma.hbm_to_vmem [thread:$0]  %s673_s2, 256, %s43_s14, [#allocation6], %s530_s7, %s530_s7, %s531_s8  }
  0x34   :  { %s534_s11 = smov [#allocation8]   ;;  %s477_s16 = scalar_lea.hbm %s675_s4, 256 }
  0x35   :  { %s56_s12 = sshll.u32 %s534_s11, 4  ;;  %p478_p10 = scmp.ne.s32.totalorder %s675_s4, %s477_s16  ;;  %s57_s12 = int_to_ptr.vmem [resolvable:$true] %s56_s12 }
  0x36   :  { %p481_p11 = scmp.lt.u32.totalorder %s477_s16, %s675_s4 }
  0x38   :  { %p483_p12 = pnand %p481_p11, %p478_p10 }
  0x3a   :  { %486 = shalt.err (!%p483_p12)
}
  0x3b   :  { %s487_s21 = scalar_lea.vmem %s57_s12, 256  ;;  %p492_p0 = scmp.lt.s32.totalorder %s57_s12, %s57_s12 }
  0x3c   :  { %p488_p13 = scmp.ne.s32.totalorder %s57_s12, %s487_s21  ;;  %p493_p1 = scmp.lt.s32.totalorder %s487_s21, %s487_s21 }
  0x3e   :  { %p494_p2 = por %p493_p1, %p492_p0 }
  0x40   :  { %p495_p3 = pnand %p494_p2, %p488_p13 }
  0x42   :  { %498 = shalt.err (!%p495_p3)
}
  0x43   :  { %62 = dma.hbm_to_vmem [thread:$0]  %s675_s4, 256, %s57_s12, [#allocation9], %s530_s7, %s530_s7, %s531_s8  }
  0x44   :  { %521 = dma.done.wait [#allocation3], 128  }
  0x45   :  { %522 = vsyncadd [#allocation3], 4294967168 }
  0x46   :  { %523 = dma.done.wait [#allocation6], 384  }
  0x47   :  { %524 = vsyncadd [#allocation6], 4294966912 }
  0x48   :  { %525 = dma.done.wait [#allocation9], 256  }
  0x49   :  { %526 = vsyncadd [#allocation9], 4294967040  ;;  %v535_v0 = vmov 0.0   ;;  %vm536_vm0 = vmmov 0   ;;  %v402_v1 = vld [vmem:[#allocation5] sm:$0xff]   ;;  %v78_v2 = vld [vmem:[#allocation2] sm:$0xff]  ;;  %v160_v31 = vlaneseq }
  0x4a   :  { %371 = vmatprep.subr.bf16.mxu0 %v535_v0  ;;  %373 = vmatprep.mubr.msk.bf16.mxu0 %vm536_vm0, %v535_v0  ;;  %vm88_vm1 = vcmask 130048   ;;  %v79_v3 = vpack.c.bf16 %v78_v2, %v78_v2  ;;  %v403_v4 = vld [vmem:[#allocation7] sm:$0xff]   ;;  %v404_v5 = vld [vmem:[#allocation7 + $0x8] sm:$0xff]   ;;  %vm132_vm2 = vcmask 261120   ;;  %v153_v33 = vld [vmem:[%s674_s3] sm:$0x1] }
  0x4b   :  { %377 = vmatprep.subr.bf16.mxu1 %v535_v0  ;;  %381 = vmatprep.mubr.msk.bf16.mxu1 %vm536_vm0, %v535_v0  ;;  %v161_v32 = vshrl.u32 %v160_v31, 7  ;;  %v154_v37 = vld [vmem:[%s674_s3 + $0x1] sm:$0x1]  ;;  %v406_v47 = vld [vmem:[#allocation8 + $0x8] sm:$0xff]   ;;  %s537_s28 = smov [#allocation10]  }
  0x4c   :  { %372 = vmatpush3.bf16.msra.mxu0 %v402_v1  ;;  %378 = vmatpush3.bf16.msra.mxu1 %v403_v4  ;;  %v405_v46 = vld [vmem:[#allocation8] sm:$0xff]   ;;  %s343_s29 = sshll.u32 %s537_s28, 4  ;;  %s344_s29 = int_to_ptr.vmem [resolvable:$true] %s343_s29 }
  0x4d   :  { %385 = vmatprep.subr.bf16.mxu0 %v535_v0  ;;  %379 = vmatprep.subr.bf16.mxu1 %v535_v0  ;;  %v162_v34 = vsub.s32 0, %v161_v32  ;;  %p504_p5 = scmp.lt.s32.totalorder %s344_s29, %s344_s29 }
  0x4f   :  { %374 = vmatmul.mubr.msk.bf16.vlgmr.msra.gmra.mrb[0].mxu0 %vm88_vm1, %v79_v3 }
  0x50   :  { %389 = vmatprep.mubr.msk.bf16.mxu0 %vm536_vm0, %v535_v0  ;;  %380 = vmatpush3.bf16.msra.mxu1 %v404_v5 }
  0x51   :  { %386 = vmatpush3.bf16.msra.mxu0 %v405_v46 }
  0x52   :  { %387 = vmatprep.subr.bf16.mxu0 %v535_v0 }
  0x55   :  { %388 = vmatpush3.bf16.msra.mxu0 %v406_v47 }
 0x122   :  { %v126_v6 = vpop.f32.mrb[0].mxu0 }
 0x123   :  { %v133_v7 = vsel %vm132_vm2, %v126_v6, 0.0  ;;  %v140_v8 = vmul.f32 %v126_v6, %v126_v6  ;;  %v375_v9 = vpop.f32.mrb[1].mxu0 }
 0x124   :  { %v134_v10 = vrot.slane %v133_v7, 4  ;;  %v129_v11 = vpop.f32.mrb[2].mxu0  ;;  %v251_v9 = vld [vmem:[%s674_s3 + $0x2] sm:$0x1] }
 0x125   :  { %v141_v12 = vsel %vm132_vm2, %v140_v8, 0.0  ;;  %v376_v13 = vpop.f32.mrb[3].mxu0 }
 0x126   :  { %v135_v14 = vadd.f32 %v134_v10, %v133_v7  ;;  %v142_v15 = vrot.slane %v141_v12, 4 }
 0x128   :  { %v136_v16 = vrot.slane %v135_v14, 2  ;;  %v143_v17 = vadd.f32 %v142_v15, %v141_v12  ;;  %v252_v12 = vld [vmem:[%s674_s3 + $0x3] sm:$0x1]  ;;  %s499_s3 = scalar_lea.vmem %s344_s29, 128 }
 0x129   :  { %p500_p4 = scmp.ne.s32.totalorder %s344_s29, %s499_s3  ;;  %p505_p6 = scmp.lt.s32.totalorder %s499_s3, %s499_s3 }
 0x12a   :  { %v137_v18 = vadd.f32 %v136_v16, %v135_v14  ;;  %v144_v19 = vrot.slane %v143_v17, 2 }
 0x12b   :  { %p506_p7 = por %p505_p6, %p504_p5 }
 0x12c   :  { %v138_v20 = vrot.slane %v137_v18, 1  ;;  %v145_v21 = vadd.f32 %v144_v19, %v143_v17 }
 0x12d   :  { %p507_p8 = pnand %p506_p7, %p500_p4 }
 0x12e   :  { %v139_v22 = vadd.f32 %v138_v20, %v137_v18  ;;  %v146_v23 = vrot.slane %v145_v21, 1 }
 0x130   :  { %v147_v24 = vadd.f32 %v146_v23, %v145_v21  ;;  %v148_v25 = vmul.f32 0.125, %v139_v22  ;;  %v359_v21 = vld [vmem:[%s676_s5] ss:$0 sm:$0xff] }
 0x132   :  { %v149_v26 = vmul.f32 0.125, %v147_v24  ;;  %v150_v27 = vmul.f32 %v148_v25, %v148_v25 }
 0x134   :  { %v151_v28 = vsub.f32 %v149_v26, %v150_v27 }
 0x136   :  { %v152_v29 = vmax.f32 %v151_v28, 0.0 }
 0x138   :  { %v155_v30 = vadd.f32 1e-05, %v152_v29 }
 0x13a   :  { %407 = vrsqrt.f32 %v155_v30 }
 0x144   :  { %v408_v35 = vpop.eup %407 }
 0x145   :  { %v157_v36 = vmul.f32 %v408_v35, %v153_v33 }
 0x147   :  { %v158_v38 = vmul.f32 %v157_v36, %v148_v25  ;;  %v163_v39 = vrot.slane %v157_v36, %v162_v34 }
 0x149   :  { %v159_v40 = vsub.f32 %v154_v37, %v158_v38  ;;  %v164_v41 = vmul.f32 %v163_v39, %v126_v6 }
 0x14b   :  { %v168_v42 = vrot.slane %v159_v40, %v162_v34 }
 0x14d   :  { %v169_v43 = vadd.f32 %v168_v42, %v164_v41 }
 0x14f   :  { %v170_v44 = vmax.f32 %v169_v43, 0.0 }
 0x151   :  { %v171_v45 = vpack.c.bf16 %v170_v44, %v170_v44 }
 0x153   :  { %382 = vmatmul.mubr.msk.bf16.vlgmr.msra.gmra.mrb[0].mxu1 %vm132_vm2, %v171_v45 }
 0x226   :  { %v225_v48 = vpop.f32.mrb[0].mxu1 }
 0x227   :  { %v231_v49 = vsel %vm132_vm2, %v225_v48, 0.0  ;;  %v238_v50 = vmul.f32 %v225_v48, %v225_v48  ;;  %v383_v51 = vpop.f32.mrb[1].mxu1 }
 0x228   :  { %v232_v52 = vrot.slane %v231_v49, 4  ;;  %v228_v53 = vpop.f32.mrb[2].mxu1 }
 0x229   :  { %v239_v54 = vsel %vm132_vm2, %v238_v50, 0.0  ;;  %v384_v55 = vpop.f32.mrb[3].mxu1 }
 0x22a   :  { %v233_v56 = vadd.f32 %v232_v52, %v231_v49  ;;  %v240_v57 = vrot.slane %v239_v54, 4 }
 0x22c   :  { %v234_v58 = vrot.slane %v233_v56, 2  ;;  %v241_v59 = vadd.f32 %v240_v57, %v239_v54 }
 0x22e   :  { %v235_v60 = vadd.f32 %v234_v58, %v233_v56  ;;  %v242_v61 = vrot.slane %v241_v59, 2 }
 0x230   :  { %v236_v62 = vrot.slane %v235_v60, 1  ;;  %v243_v63 = vadd.f32 %v242_v61, %v241_v59 }
 0x232   :  { %v237_v0 = vadd.f32 %v236_v62, %v235_v60  ;;  %v244_v1 = vrot.slane %v243_v63, 1 }
 0x234   :  { %v245_v2 = vadd.f32 %v244_v1, %v243_v63  ;;  %v246_v3 = vmul.f32 0.125, %v237_v0 }
 0x236   :  { %v247_v4 = vmul.f32 0.125, %v245_v2  ;;  %v248_v5 = vmul.f32 %v246_v3, %v246_v3 }
 0x238   :  { %v249_v6 = vsub.f32 %v247_v4, %v248_v5 }
 0x23a   :  { %v250_v7 = vmax.f32 %v249_v6, 0.0 }
 0x23c   :  { %v253_v8 = vadd.f32 1e-05, %v250_v7 }
 0x23e   :  { %409 = vrsqrt.f32 %v253_v8 }
 0x248   :  { %v410_v10 = vpop.eup %409 }
 0x249   :  { %v255_v11 = vmul.f32 %v410_v10, %v251_v9 }
 0x24b   :  { %v256_v13 = vmul.f32 %v255_v11, %v246_v3  ;;  %v261_v14 = vrot.slane %v255_v11, %v162_v34 }
 0x24d   :  { %v257_v15 = vsub.f32 %v252_v12, %v256_v13  ;;  %v262_v16 = vmul.f32 %v261_v14, %v225_v48 }
 0x24f   :  { %v266_v17 = vrot.slane %v257_v15, %v162_v34 }
 0x251   :  { %v267_v18 = vadd.f32 %v266_v17, %v262_v16 }
 0x253   :  { %v268_v19 = vmax.f32 %v267_v18, 0.0 }
 0x255   :  { %v269_v20 = vpack.c.bf16 %v268_v19, %v268_v19 }
 0x257   :  { %390 = vmatmul.mubr.msk.bf16.vlgmr.msra.gmra.mrb[4].mxu0 %vm132_vm2, %v269_v20 }
 0x32a   :  { %v330_v22 = vpop.f32.mrb[4].mxu0 }
 0x32b   :  { %v331_v23 = vadd.f32 %v359_v21, %v330_v22  ;;  %v391_v24 = vpop.f32.mrb[5].mxu0 }
 0x32c   :  { %v333_v25 = vpop.f32.mrb[6].mxu0 }
 0x32d   :  { %336 = vst [vmem:[#allocation10] sm:$0xff] %v331_v23  ;;  %v392_v26 = vpop.f32.mrb[7].mxu0 }
 0x32e   :  { %510 = shalt.err (!%p507_p8)
}
 0x32f   :  { %s511_s5 = scalar_lea.hbm %s677_s6, 128 }
 0x330   :  { %p512_p9 = scmp.ne.s32.totalorder %s677_s6, %s511_s5  ;;  %p515_p10 = scmp.lt.u32.totalorder %s511_s5, %s677_s6 }
 0x332   :  { %p517_p11 = pnand %p515_p10, %p512_p9 }
 0x334   :  { %520 = shalt.err (!%p517_p11)
}
 0x335   :  { %346 = dma.vmem_to_hbm [thread:$0]  %s344_s29, 128, %s677_s6, [#allocation4]  }
 0x336   :  { %527 = dma.done.wait [#allocation4], 128  }
 0x337   :  { %528 = vsyncadd [#allocation4], 4294967168 }
 0x338   :  { %350 = vsyncpa [#allocation3], 1 }
 0x339   :  { %351 = vsyncpa [#allocation6], 1 }
 0x33a   :  { %352 = vsyncpa [#allocation9], 1 }
 0x33b   :  { %353 = vsyncpa [#allocation4], 1 }

</bundles_post_ra>
